<compile_context>
chip_gen: v6e
topology: v6e:2x2x1
jax: 0.10.0
libtpu: 0.0.40
codegen_flags: <defaults>
</compile_context>

<pallas_src>
import jax
import jax.numpy as jnp
from jax.experimental import pallas as pl
from jax.experimental.pallas import tpu as pltpu


# Per-block target of *real* input bytes (~1 MiB-class blocks reach ~85% of the
# HBM roofline per the measured guidance; per-grid-step overhead ~0.35 us).
_TARGET_BLOCK_BYTES = 1 << 20
# Explicit scoped-VMEM budget: v5e's default is only 16 MiB; 32 MiB is the
# default (and safe) on v6e / v7x and leaves 2x headroom over our ~16 MiB of
# double-buffered in+out blocks.
_VMEM_LIMIT_BYTES = 32 * 1024 * 1024


def _linear_kernel(a_self_ref, a_swap_ref, bias_ref, x_ref, o_ref):
    # a_self/a_swap/bias: (1, 2, 1) VMEM per-output-channel coefficients
    #   a_self = [W00, W11], a_swap = [W01, W10], bias = [b0, b1]
    # x_ref / o_ref: (b_tile, 2, s_tile) VMEM  (channels on sublanes, S on lanes)
    x = x_ref[...].astype(jnp.float32)
    # Channel-swapped copy: axis 1 has length 2, so this is just a sublane swap
    # (slice + concat along the second-minor axis; no cross-lane work).
    x_sw = jnp.concatenate([x[:, 1:2, :], x[:, 0:1, :]], axis=1)
    # y[:, o, :] = W[o, o] * x[:, o, :] + W[o, 1-o] * x[:, 1-o, :] + b[o]
    y = a_self_ref[...] * x + a_swap_ref[...] * x_sw + bias_ref[...]
    # Single full-block store (lane-dense; one store instead of two masked ones).
    o_ref[...] = y.astype(o_ref.dtype)


def _largest_divisor(n, limit, multiple_of=1):
    """Largest d <= limit with n % d == 0 and d % multiple_of == 0 (0 if none)."""
    best = 0
    d = 1
    while d * d <= n:
        if n % d == 0:
            for cand in (d, n // d):
                if cand <= limit and cand % multiple_of == 0 and cand > best:
                    best = cand
        d += 1
    return best


def _plan_tiles(B, S, itemsize):
    """Pick (b_tile, s_tile) for blocks of shape (b_tile, 2, s_tile)."""
    row_bytes = 2 * S * itemsize  # real bytes of one batch element
    # --- S tiling: multiples of 128 lanes when S allows, else the full dim ---
    if S % 128 == 0 and row_bytes > _TARGET_BLOCK_BYTES:
        s_tile = _largest_divisor(
            S, max(_TARGET_BLOCK_BYTES // (2 * itemsize), 128), multiple_of=128)
        if s_tile == 0:
            s_tile = S
    else:
        # Full S (block dim == array dim is always legal).  For very large
        # non-128-multiple S this can exceed the byte target; acceptable edge.
        s_tile = S
    blk_row_bytes = 2 * s_tile * itemsize
    # --- fold batch rows into the block up to the byte target ---
    max_b = max(_TARGET_BLOCK_BYTES // blk_row_bytes, 1)
    b_tile = _largest_divisor(B, min(max_b, B))
    if b_tile == 0:
        b_tile = 1
    # --- keep >=2 "parallel" grid steps when the problem is big enough, so
    #     both v7x TensorCores get work; tiny problems stay a single block ---
    if (B // b_tile) * (S // s_tile) < 2 and B * row_bytes >= (512 << 10):
        half = _largest_divisor(B, max(b_tile // 2, 1))
        if 1 <= half < B:
            b_tile = half
    return b_tile, s_tile


def pallas_linear_channels_first(x1, weight, bias):
    """x1: (B, 2, S); weight: (2, 2); bias: (2,) -> (B, 2, S) with
    out[b, o, s] = sum_c W[o, c] * x1[b, c, s] + bias[o]."""
    B, C, S = x1.shape
    N, K = weight.shape
    assert C == 2 and K == 2 and N == 2

    # O(1) rearrangement of the 2x2 weight into per-channel coefficient vectors
    # shaped to broadcast against (b_tile, 2, s_tile) blocks (not an O(N)
    # pre-scaling of the input tensor).
    f32 = jnp.float32
    a_self = jnp.stack([weight[0, 0], weight[1, 1]]).reshape(1, 2, 1).astype(f32)
    a_swap = jnp.stack([weight[0, 1], weight[1, 0]]).reshape(1, 2, 1).astype(f32)
    bias_c = bias.reshape(1, 2, 1).astype(f32)

    b_tile, s_tile = _plan_tiles(B, S, jnp.dtype(x1.dtype).itemsize)
    grid = (B // b_tile, S // s_tile)

    coef_spec = pl.BlockSpec((1, 2, 1), lambda b, s: (0, 0, 0))
    return pl.pallas_call(
        _linear_kernel,
        out_shape=jax.ShapeDtypeStruct((B, N, S), x1.dtype),
        grid=grid,
        in_specs=[
            coef_spec,                                            # a_self
            coef_spec,                                            # a_swap
            coef_spec,                                            # bias
            pl.BlockSpec((b_tile, C, s_tile), lambda b, s: (b, 0, s)),
        ],
        out_specs=pl.BlockSpec((b_tile, N, s_tile), lambda b, s: (b, 0, s)),
        compiler_params=pltpu.CompilerParams(
            dimension_semantics=("parallel", "parallel"),
            vmem_limit_bytes=_VMEM_LIMIT_BYTES),
    )(a_self, a_swap, bias_c, x1)


def model_forward(x1, weight, bias):
    """x1: (B, 2, S) -> linear(x1.permute(0,2,1)) : (B, S, 2)."""
    out_cs = pallas_linear_channels_first(x1, weight, bias)   # (B, 2, S)
    # PyTorch's forward returns (B, S, 2).  The kernel keeps the lane-dense
    # channels-first layout (review option (a)); this final permute is plain
    # XLA layout glue, kept only to present PyTorch's exact return layout —
    # a fused downstream consumer should take `out_cs` directly and absorb it.
    return jnp.transpose(out_cs, (0, 2, 1))


if __name__ == "__main__":
    key = jax.random.PRNGKey(0)
    k_x, k_w, k_b = jax.random.split(key, 3)

    # Small shapes consistent with the module: Linear(2, 2); x1 = (5, 2, 3)
    # so that permute(0, 2, 1) gives a trailing feature dim of 2.
    B, S = 5, 3
    x1 = jax.random.normal(k_x, (B, 2, S), dtype=jnp.float32)

    # Deterministic Linear(2, 2) params (PyTorch-style uniform init bound).
    bound = 1.0 / jnp.sqrt(2.0)
    weight = jax.random.uniform(k_w, (2, 2), minval=-bound, maxval=bound,
                                dtype=jnp.float32)
    bias = jax.random.uniform(k_b, (2,), minval=-bound, maxval=bound,
                              dtype=jnp.float32)

    out = model_forward(x1, weight, bias)
    jax.block_until_ready(out)

    # Reference check in plain JAX (nn.Linear semantics on the permuted input).
    ref = jnp.einsum("bsc,oc->bso", jnp.transpose(x1, (0, 2, 1)), weight) + bias
    assert out.shape == (B, S, 2)
    assert jnp.allclose(out, ref, atol=1e-5, rtol=1e-5)

    print("KERNEL_OK")
</pallas_src>

<mosaic_0001>
module attributes {stable_mosaic.version = 11 : i64} {
  func.func @_linear_kernel(%arg0: i32, %arg1: i32, %arg2: memref<1x2x1xf32, #tpu.memory_space<vmem>>, %arg3: memref<1x2x1xf32, #tpu.memory_space<vmem>>, %arg4: memref<1x2x1xf32, #tpu.memory_space<vmem>>, %arg5: memref<5x2x3xf32, #tpu.memory_space<vmem>>, %arg6: memref<5x2x3xf32, #tpu.memory_space<vmem>>) attributes {dimension_semantics = [#tpu.dimension_semantics<parallel>, #tpu.dimension_semantics<parallel>], iteration_bounds = array<i64: 1, 1>, scalar_prefetch = 0 : i64, scratch_operands = 0 : i64, tpu.core_type = #tpu.core_type<tc>, window_params = [{pipeline_mode = #tpu.pipeline_mode<synchronous>, transform_indices = @transform_0, window_bounds = array<i64: 1, 2, 1>}, {pipeline_mode = #tpu.pipeline_mode<synchronous>, transform_indices = @transform_1, window_bounds = array<i64: 1, 2, 1>}, {pipeline_mode = #tpu.pipeline_mode<synchronous>, transform_indices = @transform_2, window_bounds = array<i64: 1, 2, 1>}, {transform_indices = @transform_3, window_bounds = array<i64: 5, 2, 3>}, {transform_indices = @transform_4, window_bounds = array<i64: 5, 2, 3>}]} {
    %c0 = arith.constant 0 : index
    %c0_0 = arith.constant 0 : index
    %c0_1 = arith.constant 0 : index
    %0 = vector.load %arg5[%c0, %c0_0, %c0_1] : memref<5x2x3xf32, #tpu.memory_space<vmem>>, vector<5x2x3xf32>
    %1 = vector.extract_strided_slice %0 {offsets = [0, 1, 0], sizes = [5, 1, 3], strides = [1, 1, 1]} : vector<5x2x3xf32> to vector<5x1x3xf32>
    %2 = vector.extract_strided_slice %0 {offsets = [0, 0, 0], sizes = [5, 1, 3], strides = [1, 1, 1]} : vector<5x2x3xf32> to vector<5x1x3xf32>
    %3 = tpu.concatenate %1, %2 in 1 : vector<5x1x3xf32>, vector<5x1x3xf32> -> vector<5x2x3xf32>
    %c0_2 = arith.constant 0 : index
    %c0_3 = arith.constant 0 : index
    %c0_4 = arith.constant 0 : index
    %4 = vector.load %arg2[%c0_2, %c0_3, %c0_4] : memref<1x2x1xf32, #tpu.memory_space<vmem>>, vector<1x2x1xf32>
    %5 = vector.broadcast %4 : vector<1x2x1xf32> to vector<5x2x3xf32>
    %6 = arith.mulf %5, %0 : vector<5x2x3xf32>
    %c0_5 = arith.constant 0 : index
    %c0_6 = arith.constant 0 : index
    %c0_7 = arith.constant 0 : index
    %7 = vector.load %arg3[%c0_5, %c0_6, %c0_7] : memref<1x2x1xf32, #tpu.memory_space<vmem>>, vector<1x2x1xf32>
    %8 = vector.broadcast %7 : vector<1x2x1xf32> to vector<5x2x3xf32>
    %9 = arith.mulf %8, %3 : vector<5x2x3xf32>
    %10 = arith.addf %6, %9 : vector<5x2x3xf32>
    %c0_8 = arith.constant 0 : index
    %c0_9 = arith.constant 0 : index
    %c0_10 = arith.constant 0 : index
    %11 = vector.load %arg4[%c0_8, %c0_9, %c0_10] : memref<1x2x1xf32, #tpu.memory_space<vmem>>, vector<1x2x1xf32>
    %12 = vector.broadcast %11 : vector<1x2x1xf32> to vector<5x2x3xf32>
    %13 = arith.addf %10, %12 : vector<5x2x3xf32>
    %c0_11 = arith.constant 0 : index
    %c0_12 = arith.constant 0 : index
    %c0_13 = arith.constant 0 : index
    %14 = vector.load %arg6[%c0_11, %c0_12, %c0_13] : memref<5x2x3xf32, #tpu.memory_space<vmem>>, vector<5x2x3xf32>
    tpu.vector_store %arg6[%c0_11, %c0_12, %c0_13], %13 {strides = array<i32>} : memref<5x2x3xf32, #tpu.memory_space<vmem>>, vector<5x2x3xf32>,
    return
  }
  func.func @transform_0(%arg0: i32, %arg1: i32) -> (i32, i32, i32) {
    %c0_i32 = arith.constant 0 : i32
    %c0_i32_0 = arith.constant 0 : i32
    %c0_i32_1 = arith.constant 0 : i32
    %c0_i32_2 = arith.constant 0 : i32
    return %c0_i32, %c0_i32_0, %c0_i32_1 : i32, i32, i32
  }
  func.func @transform_1(%arg0: i32, %arg1: i32) -> (i32, i32, i32) {
    %c0_i32 = arith.constant 0 : i32
    %c0_i32_0 = arith.constant 0 : i32
    %c0_i32_1 = arith.constant 0 : i32
    %c0_i32_2 = arith.constant 0 : i32
    return %c0_i32, %c0_i32_0, %c0_i32_1 : i32, i32, i32
  }
  func.func @transform_2(%arg0: i32, %arg1: i32) -> (i32, i32, i32) {
    %c0_i32 = arith.constant 0 : i32
    %c0_i32_0 = arith.constant 0 : i32
    %c0_i32_1 = arith.constant 0 : i32
    %c0_i32_2 = arith.constant 0 : i32
    return %c0_i32, %c0_i32_0, %c0_i32_1 : i32, i32, i32
  }
  func.func @transform_3(%arg0: i32, %arg1: i32) -> (i32, i32, i32) {
    %c0_i32 = arith.constant 0 : i32
    %c0_i32_0 = arith.constant 0 : i32
    return %arg0, %c0_i32, %arg1 : i32, i32, i32
  }
  func.func @transform_4(%arg0: i32, %arg1: i32) -> (i32, i32, i32) {
    %c0_i32 = arith.constant 0 : i32
    %c0_i32_0 = arith.constant 0 : i32
    return %arg0, %c0_i32, %arg1 : i32, i32, i32
  }
}

</mosaic_0001>

<bundles_post_ra>
// kernel: tpu_custom_call.1
= control target key start
LH: loop header
LB: loop body
LE: loop exit
PB: predicated region body
PF: predicated region fallthrough
CT: control target
= control target key end

     0   :  { %v104_v0 = vmov 0   ;;  %vm47_vm0 = vcmask 1040384   ;;  %vm91_vm1 = vcmask 17408   ;;  %s169_s0 = inlined_call_operand.vmem [shape: f32[1,2,1], index: 0, kind: input, shape index: {}]   ;;  %s170_s1 = inlined_call_operand.vmem [shape: f32[1,2,1], index: 1, kind: input, shape index: {}]   ;;  %s171_s2 = inlined_call_operand.vmem [shape: f32[1,2,1], index: 2, kind: input, shape index: {}]   ;;  %s172_s3 = inlined_call_operand.vmem [shape: f32[5,2,3], index: 3, kind: input, shape index: {}]   ;;  %s173_s4 = inlined_call_operand.vmem [shape: f32[5,2,3], index: 4, kind: output, shape index: {}]  }
   0x1   :  { %102 = vset.pattern.permute.xlu0 %v104_v0  ;;  %v53_v1 = vld [vmem:[%s169_s0] sm:$0x3]  ;;  %103 = vset.pattern.permute.xlu1 %v104_v0  ;;  %v18_v5 = vld [vmem:[%s172_s3 + $0x2] sm:$0x3]  ;;  %v19_v6 = vld [vmem:[%s172_s3 + $0x4] sm:$0x3] }
   0x2   :  { %v80_v2 = vld [vmem:[%s171_s2] sm:$0x3]  ;;  %56 = vperm.xlu0 %102, %v53_v1   ;;  %v20_v7 = vld [vmem:[%s172_s3 + $0x6] sm:$0x3]  ;;  %v21_v8 = vld [vmem:[%s172_s3 + $0x8] sm:$0x3] }
   0x3   :  { %83 = vperm.xlu1 %103, %v80_v2   ;;  %v64_v3 = vld [vmem:[%s170_s1] sm:$0x3]  ;;  %v28_v10 = vrot.slane %v18_v5, 1  ;;  %v29_v11 = vrot.slane %v19_v6, 1  ;;  %v30_v12 = vrot.slane %v20_v7, 1  ;;  %v38_v14 = vrot.slane %v18_v5, 7 }
   0x4   :  { %v17_v4 = vld [vmem:[%s172_s3] sm:$0x3]  ;;  %v39_v15 = vrot.slane %v19_v6, 7  ;;  %v40_v16 = vrot.slane %v20_v7, 7  ;;  %v31_v17 = vrot.slane %v21_v8, 1  ;;  %v41_v18 = vrot.slane %v21_v8, 7 }
   0x5   :  { %v27_v9 = vrot.slane %v17_v4, 1  ;;  %v37_v13 = vrot.slane %v17_v4, 7  ;;  %v49_v21 = vsel %vm47_vm0, %v28_v10, %v38_v14 }
   0x6   :  { %67 = vperm.xlu0 %102, %v64_v3   ;;  %v50_v22 = vsel %vm47_vm0, %v29_v11, %v39_v15  ;;  %v51_v23 = vsel %vm47_vm0, %v30_v12, %v40_v16  ;;  %v52_v24 = vsel %vm47_vm0, %v31_v17, %v41_v18 }
   0x7   :  { %v48_v20 = vsel %vm47_vm0, %v27_v9, %v37_v13 }
  0x7d   :  { %v57_v19 = vpop.permute.xlu0 %56 }
  0x7e   :  { %v59_v25 = vmul.f32 %v57_v19, %v17_v4  ;;  %v60_v26 = vmul.f32 %v57_v19, %v18_v5  ;;  %v61_v27 = vmul.f32 %v57_v19, %v19_v6  ;;  %v62_v28 = vmul.f32 %v57_v19, %v20_v7  ;;  %v84_v36 = vpop.permute.xlu1 %83 }
  0x7f   :  { %v63_v34 = vmul.f32 %v57_v19, %v21_v8 }
  0x81   :  { %v68_v29 = vpop.permute.xlu0 %67 }
  0x82   :  { %v70_v30 = vmul.f32 %v68_v29, %v48_v20  ;;  %v71_v31 = vmul.f32 %v68_v29, %v49_v21  ;;  %v72_v32 = vmul.f32 %v68_v29, %v50_v22  ;;  %v73_v33 = vmul.f32 %v68_v29, %v51_v23 }
  0x83   :  { %v74_v35 = vmul.f32 %v68_v29, %v52_v24 }
  0x84   :  { %v75_v37 = vadd.f32 %v70_v30, %v59_v25  ;;  %v76_v38 = vadd.f32 %v71_v31, %v60_v26  ;;  %v77_v39 = vadd.f32 %v72_v32, %v61_v27  ;;  %v78_v40 = vadd.f32 %v73_v33, %v62_v28 }
  0x85   :  { %v79_v41 = vadd.f32 %v74_v35, %v63_v34 }
  0x86   :  { %v86_v42 = vadd.f32 %v84_v36, %v75_v37  ;;  %v87_v43 = vadd.f32 %v84_v36, %v76_v38  ;;  %v88_v44 = vadd.f32 %v84_v36, %v77_v39  ;;  %v89_v45 = vadd.f32 %v84_v36, %v78_v40 }
  0x87   :  { %v90_v46 = vadd.f32 %v84_v36, %v79_v41 }
  0x88   :  { %92 = vst.msk [vmem:[%s173_s4] sm:$0x3] %vm91_vm1, %v86_v42  ;;  %93 = vst.msk [vmem:[%s173_s4 + $0x2] sm:$0x3] %vm91_vm1, %v87_v43 }
  0x89   :  { %94 = vst.msk [vmem:[%s173_s4 + $0x4] sm:$0x3] %vm91_vm1, %v88_v44  ;;  %95 = vst.msk [vmem:[%s173_s4 + $0x6] sm:$0x3] %vm91_vm1, %v89_v45 }
  0x8a   :  { %96 = vst.msk [vmem:[%s173_s4 + $0x8] sm:$0x3] %vm91_vm1, %v90_v46 }

</bundles_post_ra>
